<compile_context>
chip_gen: v5e
topology: v5e:2x2
jax: 0.10.0
libtpu: 0.0.40
codegen_flags: <defaults>
</compile_context>

<pallas_src>
import functools

import jax
import jax.numpy as jnp
from jax.experimental import pallas as pl
from jax.experimental.pallas import tpu as pltpu


def _round_up(v, m):
    return ((v + m - 1) // m) * m


def _logreg_kernel(x_ref, wt_ref, b_ref, out_ref, sm_ref, lsm_ref, *, o_valid):
    # x_ref:  [TB, D]      batch tile
    # wt_ref: [D,  O_pad]  pre-transposed weight (resident across grid steps)
    # b_ref:  [1,  O_pad]  bias (-inf in padded lanes)
    # out/sm/lsm refs: [TB, O]  exact-width outputs (O = o_valid)
    x = x_ref[...]
    wt = wt_ref[...]
    b = b_ref[...]

    # logits = x @ w_t + b   (MXU, f32 accumulate).  Padded lanes are -inf.
    logits = jnp.dot(x, wt, preferred_element_type=jnp.float32) + b  # [TB, O_pad]

    # Numerically stable softmax / log_softmax along last axis.
    m = jnp.max(logits, axis=-1, keepdims=True)             # [TB, 1] (finite)
    shifted = logits - m                                     # [TB, O_pad]
    e = jnp.exp(shifted)                                     # exp(-inf) = 0 on pads
    s = jnp.sum(e, axis=-1, keepdims=True)                   # [TB, 1]

    softmax = e / s                                          # exact divide (tiny)
    log_softmax = shifted - jnp.log(s)                       # [TB, O_pad]

    # Store only the valid O lanes — exact-width outputs, no wrapper-side slice.
    out_ref[...] = logits[:, :o_valid].astype(out_ref.dtype)
    sm_ref[...] = softmax[:, :o_valid].astype(sm_ref.dtype)
    lsm_ref[...] = log_softmax[:, :o_valid].astype(lsm_ref.dtype)


@functools.partial(jax.jit, static_argnames=("block_b",))
def logistic_regression_forward(x, weight, bias, *, block_b=1024):
    """x: [B, D], weight: [O, D] (PyTorch layout), bias: [O].

    Returns (logits, softmax, log_softmax), each [B, O] float32.
    """
    B, D = x.shape
    O = weight.shape[0]

    # --- layout plumbing (one-time, outside the kernel) -----------------
    # Pre-transpose weight -> [D, O]; pad the output dim to a lane-dense
    # multiple of 128 for the in-VMEM compute only.  Padded weight columns are
    # zero; padded bias lanes are -inf so exp(shifted) == 0 there and softmax
    # over the real lanes is exact.  Outputs are stored at exact O width.
    O_pad = max(128, _round_up(O, 128))
    w_t = jnp.transpose(weight)                                      # [D, O]
    if O_pad != O:
        w_t = jnp.pad(w_t, ((0, 0), (0, O_pad - O)))                 # zeros
        bias_p = jnp.concatenate(
            [bias, jnp.full((O_pad - O,), -jnp.inf, bias.dtype)])
    else:
        bias_p = bias
    bias2d = bias_p.reshape(1, O_pad)

    # --- batch tiling ----------------------------------------------------
    # Big tiles to amortize per-grid-step overhead, but aim for >= 2 grid
    # steps when B allows it so v7x's two TensorCores both get work.
    if B <= 8:
        TB = B
    else:
        TB = min(block_b, _round_up(pl.cdiv(B, 2), 8))
    grid = (pl.cdiv(B, TB),)

    out_shapes = (
        jax.ShapeDtypeStruct((B, O), jnp.float32),
        jax.ShapeDtypeStruct((B, O), jnp.float32),
        jax.ShapeDtypeStruct((B, O), jnp.float32),
    )

    x_spec = pl.BlockSpec((TB, D), lambda i: (i, 0))
    w_spec = pl.BlockSpec((D, O_pad), lambda i: (0, 0))   # resident
    b_spec = pl.BlockSpec((1, O_pad), lambda i: (0, 0))   # resident
    o_spec = pl.BlockSpec((TB, O), lambda i: (i, 0))      # full-extent last dim

    kernel = functools.partial(_logreg_kernel, o_valid=O)

    logits, softmax, log_softmax = pl.pallas_call(
        kernel,
        out_shape=out_shapes,
        grid_spec=pltpu.PrefetchScalarGridSpec(
            num_scalar_prefetch=0,
            grid=grid,
            in_specs=[x_spec, w_spec, b_spec],
            out_specs=[o_spec, o_spec, o_spec],
        ),
        compiler_params=pltpu.CompilerParams(
            dimension_semantics=("parallel",),   # batch tiles are independent
            vmem_limit_bytes=32 * 1024 * 1024,   # safe on v7x's smaller VMEM
        ),
    )(x, w_t, bias2d)

    return logits, softmax, log_softmax


if __name__ == "__main__":
    # Small, deterministic shapes consistent with the module:
    # input_dim=32, output_dim=16, batch=8.
    batch, input_dim, output_dim = 8, 32, 16

    key = jax.random.PRNGKey(0)
    kx, kw, kb = jax.random.split(key, 3)

    x = jax.random.normal(kx, (batch, input_dim), dtype=jnp.float32)
    # Deterministic init mimicking nn.Linear's uniform(-1/sqrt(in), 1/sqrt(in)).
    bound = 1.0 / (input_dim ** 0.5)
    weight = jax.random.uniform(kw, (output_dim, input_dim), jnp.float32, -bound, bound)
    bias = jax.random.uniform(kb, (output_dim,), jnp.float32, -bound, bound)

    logits, softmax, log_softmax = logistic_regression_forward(x, weight, bias)
    jax.block_until_ready((logits, softmax, log_softmax))

    # Sanity check against plain-JAX reference.
    ref_logits = x @ weight.T + bias
    ref_softmax = jax.nn.softmax(ref_logits, axis=-1)
    ref_log_softmax = jax.nn.log_softmax(ref_logits, axis=-1)
    assert logits.shape == (batch, output_dim)
    assert jnp.allclose(logits, ref_logits, atol=1e-5)
    assert jnp.allclose(softmax, ref_softmax, atol=1e-5)
    assert jnp.allclose(log_softmax, ref_log_softmax, atol=1e-5)

    print("KERNEL_OK")
</pallas_src>

<mosaic_0001>
module attributes {stable_mosaic.version = 11 : i64} {
  func.func @_logreg_kernel(%arg0: i32, %arg1: memref<8x32xf32, #tpu.memory_space<vmem>>, %arg2: memref<32x128xf32, #tpu.memory_space<vmem>>, %arg3: memref<1x128xf32, #tpu.memory_space<vmem>>, %arg4: memref<8x16xf32, #tpu.memory_space<vmem>>, %arg5: memref<8x16xf32, #tpu.memory_space<vmem>>, %arg6: memref<8x16xf32, #tpu.memory_space<vmem>>) attributes {dimension_semantics = [#tpu.dimension_semantics<parallel>], iteration_bounds = array<i64: 1>, scalar_prefetch = 0 : i64, scratch_operands = 0 : i64, tpu.core_type = #tpu.core_type<tc>, window_params = [{transform_indices = @transform_0, window_bounds = array<i64: 8, 32>}, {pipeline_mode = #tpu.pipeline_mode<synchronous>, transform_indices = @transform_1, window_bounds = array<i64: 32, 128>}, {pipeline_mode = #tpu.pipeline_mode<synchronous>, transform_indices = @transform_2, window_bounds = array<i64: 1, 128>}, {transform_indices = @transform_3, window_bounds = array<i64: 8, 16>}, {transform_indices = @transform_4, window_bounds = array<i64: 8, 16>}, {transform_indices = @transform_5, window_bounds = array<i64: 8, 16>}]} {
    %c0 = arith.constant 0 : index
    %c0_0 = arith.constant 0 : index
    %0 = vector.load %arg1[%c0, %c0_0] : memref<8x32xf32, #tpu.memory_space<vmem>>, vector<8x32xf32>
    %c0_1 = arith.constant 0 : index
    %c0_2 = arith.constant 0 : index
    %1 = vector.load %arg2[%c0_1, %c0_2] : memref<32x128xf32, #tpu.memory_space<vmem>>, vector<32x128xf32>
    %c0_3 = arith.constant 0 : index
    %c0_4 = arith.constant 0 : index
    %2 = vector.load %arg3[%c0_3, %c0_4] : memref<1x128xf32, #tpu.memory_space<vmem>>, vector<1x128xf32>
    %cst = arith.constant dense<0.000000e+00> : vector<8x128xf32>
    %3 = tpu.matmul %0, %1, %cst {dimension_numbers = #tpu.dot_dimension_numbers<[1], [0], [0], [1], [0, 0, 1, 1], [], []>} : vector<8x32xf32>, vector<32x128xf32>, vector<8x128xf32> -> vector<8x128xf32>
    %4 = vector.broadcast %2 : vector<1x128xf32> to vector<8x128xf32>
    %5 = arith.addf %3, %4 : vector<8x128xf32>
    %cst_5 = arith.constant dense<0xFF800000> : vector<8xf32>
    %6 = vector.multi_reduction <maximumf>, %5, %cst_5 [1] : vector<8x128xf32> to vector<8xf32>
    %7 = vector.shape_cast %6 : vector<8xf32> to vector<8x1xf32>
    %8 = vector.broadcast %7 : vector<8x1xf32> to vector<8x128xf32>
    %9 = arith.subf %5, %8 : vector<8x128xf32>
    %10 = math.exp %9 : vector<8x128xf32>
    %cst_6 = arith.constant dense<0.000000e+00> : vector<8xf32>
    %11 = vector.multi_reduction <add>, %10, %cst_6 [1] : vector<8x128xf32> to vector<8xf32>
    %12 = vector.shape_cast %11 : vector<8xf32> to vector<8x1xf32>
    %13 = vector.broadcast %12 : vector<8x1xf32> to vector<8x128xf32>
    %14 = arith.divf %10, %13 : vector<8x128xf32>
    %15 = math.log %12 : vector<8x1xf32>
    %16 = vector.broadcast %15 : vector<8x1xf32> to vector<8x128xf32>
    %17 = arith.subf %9, %16 : vector<8x128xf32>
    %18 = vector.extract_strided_slice %5 {offsets = [0, 0], sizes = [8, 16], strides = [1, 1]} : vector<8x128xf32> to vector<8x16xf32>
    %c0_7 = arith.constant 0 : index
    %c0_8 = arith.constant 0 : index
    %19 = vector.load %arg4[%c0_7, %c0_8] : memref<8x16xf32, #tpu.memory_space<vmem>>, vector<8x16xf32>
    tpu.vector_store %arg4[%c0_7, %c0_8], %18 {strides = array<i32>} : memref<8x16xf32, #tpu.memory_space<vmem>>, vector<8x16xf32>,
    %20 = vector.extract_strided_slice %14 {offsets = [0, 0], sizes = [8, 16], strides = [1, 1]} : vector<8x128xf32> to vector<8x16xf32>
    %c0_9 = arith.constant 0 : index
    %c0_10 = arith.constant 0 : index
    %21 = vector.load %arg5[%c0_9, %c0_10] : memref<8x16xf32, #tpu.memory_space<vmem>>, vector<8x16xf32>
    tpu.vector_store %arg5[%c0_9, %c0_10], %20 {strides = array<i32>} : memref<8x16xf32, #tpu.memory_space<vmem>>, vector<8x16xf32>,
    %22 = vector.extract_strided_slice %17 {offsets = [0, 0], sizes = [8, 16], strides = [1, 1]} : vector<8x128xf32> to vector<8x16xf32>
    %c0_11 = arith.constant 0 : index
    %c0_12 = arith.constant 0 : index
    %23 = vector.load %arg6[%c0_11, %c0_12] : memref<8x16xf32, #tpu.memory_space<vmem>>, vector<8x16xf32>
    tpu.vector_store %arg6[%c0_11, %c0_12], %22 {strides = array<i32>} : memref<8x16xf32, #tpu.memory_space<vmem>>, vector<8x16xf32>,
    return
  }
  func.func @transform_0(%arg0: i32) -> (i32, i32) {
    %c0_i32 = arith.constant 0 : i32
    %c0_i32_0 = arith.constant 0 : i32
    return %arg0, %c0_i32 : i32, i32
  }
  func.func @transform_1(%arg0: i32) -> (i32, i32) {
    %c0_i32 = arith.constant 0 : i32
    %c0_i32_0 = arith.constant 0 : i32
    %c0_i32_1 = arith.constant 0 : i32
    return %c0_i32, %c0_i32_0 : i32, i32
  }
  func.func @transform_2(%arg0: i32) -> (i32, i32) {
    %c0_i32 = arith.constant 0 : i32
    %c0_i32_0 = arith.constant 0 : i32
    %c0_i32_1 = arith.constant 0 : i32
    return %c0_i32, %c0_i32_0 : i32, i32
  }
  func.func @transform_3(%arg0: i32) -> (i32, i32) {
    %c0_i32 = arith.constant 0 : i32
    %c0_i32_0 = arith.constant 0 : i32
    return %arg0, %c0_i32 : i32, i32
  }
  func.func @transform_4(%arg0: i32) -> (i32, i32) {
    %c0_i32 = arith.constant 0 : i32
    %c0_i32_0 = arith.constant 0 : i32
    return %arg0, %c0_i32 : i32, i32
  }
  func.func @transform_5(%arg0: i32) -> (i32, i32) {
    %c0_i32 = arith.constant 0 : i32
    %c0_i32_0 = arith.constant 0 : i32
    return %arg0, %c0_i32 : i32, i32
  }
}

</mosaic_0001>

<bundles_post_ra>
// kernel: logistic_regression_forward.1
= control target key start
LH: loop header
LB: loop body
LE: loop exit
PB: predicated region body
PF: predicated region fallthrough
CT: control target
= control target key end

     0   :  { %11 = vsyncpa [#allocation3], 0  ;;  %s278_s0 = inlined_call_operand.vmem [shape: f32[8,32], index: 0, kind: input, shape index: {}]   ;;  %s279_s1 = inlined_call_operand.vmem [shape: f32[32,128], index: 1, kind: input, shape index: {}]   ;;  %s280_s2 = inlined_call_operand.vmem [shape: f32[1,128], index: 2, kind: input, shape index: {}]   ;;  %s281_s3 = inlined_call_operand.hbm [shape: f32[8,16], index: 3, kind: output, shape index: {0}]   ;;  %s282_s4 = inlined_call_operand.hbm [shape: f32[8,16], index: 4, kind: output, shape index: {1}]   ;;  %s283_s5 = inlined_call_operand.hbm [shape: f32[8,16], index: 5, kind: output, shape index: {2}]  }
   0x1   :  { %v23_v0 = vld [vmem:[%s279_s1 + $0x18] sm:$0xff]  ;;  %v22_v1 = vld [vmem:[%s279_s1 + $0x10] sm:$0xff]  ;;  %v21_v2 = vld [vmem:[%s279_s1 + $0x8] sm:$0xff] }
   0x2   :  { %44 = vmatpush.msra.mxu0 %v23_v0 }
   0x3   :  { %12 = vsyncpa [#allocation5], 0  ;;  %v20_v3 = vld [vmem:[%s279_s1] sm:$0xff]  ;;  %vm28_vm0 = vcmask 261120   ;;  %vm77_vm1 = vcmask 130048   ;;  %s88_s30 = sshll.u32 %s281_s3, 4  ;;  %s89_s30 = int_to_ptr.hbm [resolvable:$true] %s88_s30 }
   0x4   :  { %45 = vmatpush.msra.mxu0 %v22_v1  ;;  %v19_v4 = vld [vmem:[%s278_s0] sm:$0xff]  ;;  %s215_s6 = smov [#allocation2]   ;;  %s99_s10 = sshll.u32 %s282_s4, 4  ;;  %s100_s10 = int_to_ptr.hbm [resolvable:$true] %s99_s10 }
   0x5   :  { %v132_v5 = vld [vmem:[%s280_s2] ss:$0 sm:$0xff]  ;;  %s86_s7 = sshll.u32 %s215_s6, 4  ;;  %s216_s2 = smov [#allocation4]   ;;  %s87_s7 = int_to_ptr.vmem [resolvable:$true] %s86_s7 }
   0x6   :  { %46 = vmatpush.msra.mxu0 %v21_v2  ;;  %s97_s3 = sshll.u32 %s216_s2, 4  ;;  %s217_s11 = smov [#allocation6]   ;;  %s98_s3 = int_to_ptr.vmem [resolvable:$true] %s97_s3 }
   0x7   :  { %s108_s12 = sshll.u32 %s217_s11, 4  ;;  %s110_s15 = sshll.u32 %s283_s5, 4  ;;  %s109_s12 = int_to_ptr.vmem [resolvable:$true] %s108_s12  ;;  %s111_s15 = int_to_ptr.hbm [resolvable:$true] %s110_s15 }
   0x8   :  { %47 = vmatpush.msra.mxu0 %v20_v3 }
   0x9   :  { %128 = vmatmul.msk.f32.vlgmr.msra.gmra.mxu0 %vm28_vm0, %v19_v4 }
  0x86   :  { %v49_v6 = vpop.f32.mrf.mxu0 }
  0x87   :  { %v50_v7 = vadd.f32 %v132_v5, %v49_v6 }
  0x89   :  { %52 = vmax.xlane.f32.xlu0 %v50_v7  ;;  %78 = vst.msk [vmem:[#allocation2] sm:$0xff] %vm77_vm1, %v50_v7 }
  0x8a   :  { %91 = dma.vmem_to_hbm [thread:$0]  %s87_s7, 128, %s89_s30, [#allocation3]  }
  0xfc   :  { %v53_v8 = vpop.xlane.xlu0 %52 }
  0xfd   :  { %v54_v9 = vsub.f32 %v50_v7, %v53_v8 }
  0xff   :  { %v55_v10 = vmul.f32 1.442695, %v54_v9 }
 0x101   :  { %133 = vpow2.f32 %v55_v10 }
 0x107   :  { %v134_v11 = vpop.eup %133 }
 0x108   :  { %57 = vadd.xlane.f32.xlu0 %v134_v11 }
 0x17b   :  { %v58_v12 = vpop.xlane.xlu0 %57 }
 0x17c   :  { %135 = vrcp.f32 %v58_v12  ;;  %v70_v18 = vand.u32 2147483648, %v58_v12  ;;  %v68_v21 = vand.u32 2147483647, %v58_v12  ;;  %vm64_vm3 = vweird.f32 %v58_v12 }
 0x17d   :  { %137 = vlog2.f32 %v58_v12 }
 0x17e   :  { %v71_v23 = vor.u32 1.1754944e-38, %v70_v18  ;;  %vm69_vm5 = vcmp.eq.f32.partialorder %v68_v21, 8.507059e+37 }
 0x182   :  { %v136_v13 = vpop.eup %135 }
 0x183   :  { %v138_v14 = vpop.eup %137  ;;  %v60_v15 = vmul.f32 %v136_v13, %v58_v12  ;;  %vm65_vm2 = vweird.f32 %v136_v13 }
 0x184   :  { %v75_v16 = vmul.f32 0.6931472, %v138_v14  ;;  %vm66_vm4 = vmor %vm64_vm3, %vm65_vm2 }
 0x185   :  { %v61_v17 = vsub.f32 1.0, %v60_v15 }
 0x186   :  { %v76_v19 = vsub.f32 %v54_v9, %v75_v16 }
 0x187   :  { %v62_v20 = vmul.f32 %v136_v13, %v61_v17 }
 0x188   :  { %80 = vst.msk [vmem:[#allocation6] sm:$0xff] %vm77_vm1, %v76_v19 }
 0x189   :  { %v63_v22 = vadd.f32 %v136_v13, %v62_v20 }
 0x18b   :  { %v67_v24 = vsel %vm66_vm4, %v136_v13, %v63_v22 }
 0x18c   :  { %v72_v25 = vsel %vm69_vm5, %v71_v23, %v67_v24 }
 0x18d   :  { %v73_v26 = vmul.f32 %v134_v11, %v72_v25 }
 0x18f   :  { %79 = vst.msk [vmem:[#allocation4] sm:$0xff] %vm77_vm1, %v73_v26 }
 0x190   :  { %102 = dma.vmem_to_hbm [thread:$0]  %s98_s3, 128, %s100_s10, [#allocation5]  }
 0x191   :  { %113 = dma.vmem_to_hbm [thread:$0]  %s109_s12, 128, %s111_s15, [#allocation5]  }
 0x192   :  { %211 = dma.done.wait [#allocation3], 128  }
 0x193   :  { %212 = vsyncadd [#allocation3], 4294967168 }
 0x194   :  { %213 = dma.done.wait [#allocation5], 256  }
 0x195   :  { %214 = vsyncadd [#allocation5], 4294967040 }
 0x196   :  { %126 = vsyncpa [#allocation3], 1 }
 0x197   :  { %127 = vsyncpa [#allocation5], 1 }

</bundles_post_ra>
